<compile_context>
chip_gen: v7x
topology: tpu7x:2x2x1
jax: 0.10.0
libtpu: 0.0.40
codegen_flags: <defaults>
</compile_context>

<pallas_src>
import jax
import jax.numpy as jnp
from jax.experimental import pallas as pl
from jax.experimental.pallas import tpu as pltpu

EPS = 1e-5
LANE = 128
VMEM_LIMIT = 16 * 1024 * 1024       # real per-step footprint is ~1-6 MB


def _round_up(v, m):
    return ((v + m - 1) // m) * m


def _cp(semantics):
    return pltpu.CompilerParams(dimension_semantics=semantics,
                                vmem_limit_bytes=VMEM_LIMIT)


def _pick_row_tile(m, bytes_per_row, budget=1 << 20):
    """Largest power-of-two row tile dividing m with <= ~1MB per-step rows."""
    for t in (1024, 512, 256, 128, 64, 32, 16, 8):
        if m % t == 0 and t * bytes_per_row <= budget:
            return t
    return m                                   # single full block fallback


# ---------------------------------------------------------------------------
# Kernels
# ---------------------------------------------------------------------------
def _matmul_stats_kernel(x_ref, w_ref, y_ref, sum_ref, sq_ref):
    """(tm, K)bf16 @ (K, C)bf16 -> f32 acc; store bf16 + per-step channel stats."""
    acc = jnp.dot(x_ref[...], w_ref[...], preferred_element_type=jnp.float32)
    y_ref[...] = acc.astype(y_ref.dtype)
    sum_ref[...] = jnp.sum(acc, axis=0, keepdims=True)[None]
    sq_ref[...] = jnp.sum(acc * acc, axis=0, keepdims=True)[None]


def _bn_relu_kernel(y_ref, s_ref, b_ref, o_ref):
    """relu(y * scale + bias); math in f32, storage bf16."""
    y = y_ref[...].astype(jnp.float32)
    o_ref[...] = jnp.maximum(y * s_ref[...] + b_ref[...], 0.0).astype(o_ref.dtype)


def _final_identity_kernel(y2_ref, s2_ref, b2_ref, x_ref, m_ref, o_ref):
    """bn2-apply + (x * channel-mask) residual + relu."""
    main = y2_ref[...].astype(jnp.float32) * s2_ref[...] + b2_ref[...]
    sc = x_ref[...].astype(jnp.float32) * m_ref[...]
    o_ref[...] = jnp.maximum(main + sc, 0.0)


def _final_downsample_kernel(y2_ref, s2_ref, b2_ref, sc_ref, ssc_ref, bsc_ref,
                             o_ref):
    """bn2-apply + shortcut-bn-apply + add + relu."""
    main = y2_ref[...].astype(jnp.float32) * s2_ref[...] + b2_ref[...]
    sc = sc_ref[...].astype(jnp.float32) * ssc_ref[...] + bsc_ref[...]
    o_ref[...] = jnp.maximum(main + sc, 0.0)


# ---------------------------------------------------------------------------
# pallas_call wrappers
# ---------------------------------------------------------------------------
def _matmul_stats_call(x2d, w2d, out_dtype=jnp.bfloat16):
    M, K = x2d.shape
    COUT = w2d.shape[1]
    tm = _pick_row_tile(M, 2 * K + 2 * COUT)
    g = M // tm
    y, psum, psq = pl.pallas_call(
        _matmul_stats_kernel,
        grid=(g,),
        in_specs=[pl.BlockSpec((tm, K), lambda i: (i, 0)),
                  pl.BlockSpec((K, COUT), lambda i: (0, 0))],
        out_specs=[pl.BlockSpec((tm, COUT), lambda i: (i, 0)),
                   pl.BlockSpec((1, 1, COUT), lambda i: (i, 0, 0)),
                   pl.BlockSpec((1, 1, COUT), lambda i: (i, 0, 0))],
        out_shape=[jax.ShapeDtypeStruct((M, COUT), out_dtype),
                   jax.ShapeDtypeStruct((g, 1, COUT), jnp.float32),
                   jax.ShapeDtypeStruct((g, 1, COUT), jnp.float32)],
        compiler_params=_cp(("parallel",)),
    )(x2d, w2d)
    # tiny cross-step reduction of the partial stats (wrapper / XLA)
    return y, jnp.sum(psum, axis=0), jnp.sum(psq, axis=0)        # (1, COUT)


def _bn_relu_call(ya, scale, bias, cout_p):
    # ya may be wider than cout_p (fused shortcut); read only columns [0, cout_p)
    M = ya.shape[0]
    tm = _pick_row_tile(M, 4 * cout_p)
    row = pl.BlockSpec((tm, cout_p), lambda i: (i, 0))
    vec = pl.BlockSpec((1, cout_p), lambda i: (0, 0))
    return pl.pallas_call(
        _bn_relu_kernel, grid=(M // tm,),
        in_specs=[row, vec, vec],
        out_specs=pl.BlockSpec((tm, cout_p), lambda i: (i, 0)),
        out_shape=jax.ShapeDtypeStruct((M, cout_p), jnp.bfloat16),
        compiler_params=_cp(("parallel",)),
    )(ya, scale, bias)


def _final_identity_call(y2, scale2, bias2, xc, msk, cout_p):
    M = y2.shape[0]
    tm = _pick_row_tile(M, 10 * cout_p)
    row = pl.BlockSpec((tm, cout_p), lambda i: (i, 0))
    vec = pl.BlockSpec((1, cout_p), lambda i: (0, 0))
    return pl.pallas_call(
        _final_identity_kernel, grid=(M // tm,),
        in_specs=[row, vec, vec, row, vec],
        out_specs=pl.BlockSpec((tm, cout_p), lambda i: (i, 0)),
        out_shape=jax.ShapeDtypeStruct((M, cout_p), jnp.float32),
        compiler_params=_cp(("parallel",)),
    )(y2, scale2, bias2, xc, msk)


def _final_downsample_call(y2, scale2, bias2, ya, scalesc, biassc, cout_p):
    # ya holds the shortcut pre-BN conv in its second cout_p-wide column block.
    M = y2.shape[0]
    tm = _pick_row_tile(M, 8 * cout_p)
    row = pl.BlockSpec((tm, cout_p), lambda i: (i, 0))
    sc_row = pl.BlockSpec((tm, cout_p), lambda i: (i, 1))
    vec = pl.BlockSpec((1, cout_p), lambda i: (0, 0))
    return pl.pallas_call(
        _final_downsample_kernel, grid=(M // tm,),
        in_specs=[row, vec, vec, sc_row, vec, vec],
        out_specs=pl.BlockSpec((tm, cout_p), lambda i: (i, 0)),
        out_shape=jax.ShapeDtypeStruct((M, cout_p), jnp.float32),
        compiler_params=_cp(("parallel",)),
    )(y2, scale2, bias2, ya, scalesc, biassc)


# ---------------------------------------------------------------------------
# Glue: im2col, weight packing, BN finalisation, parameter init (plain JAX)
# ---------------------------------------------------------------------------
def _im2col_3x3(x_nhwc, stride, kpad, dtype=jnp.bfloat16):
    """3x3 / pad=1 patches, K-order (kh, kw, c), K zero-padded to `kpad`."""
    N, H, W, C = x_nhwc.shape
    Ho = (H + 2 - 3) // stride + 1
    Wo = (W + 2 - 3) // stride + 1
    xp = jnp.pad(x_nhwc, ((0, 0), (1, 1), (1, 1), (0, 0)))
    cols = []
    for kh in range(3):
        for kw in range(3):
            cols.append(xp[:, kh:kh + (Ho - 1) * stride + 1:stride,
                           kw:kw + (Wo - 1) * stride + 1:stride, :])
    p = jnp.concatenate(cols, axis=-1).reshape(N * Ho * Wo, 9 * C)
    p = jnp.pad(p, ((0, 0), (0, kpad - 9 * C)))
    return p.astype(dtype), Ho, Wo


def _pack_w3x3(w_oihw, kpad, cout_p, dtype=jnp.bfloat16):
    cout, cin = w_oihw.shape[:2]
    w = jnp.transpose(w_oihw, (2, 3, 1, 0)).reshape(9 * cin, cout)  # (kh,kw,i),o
    w = jnp.pad(w, ((0, kpad - 9 * cin), (0, cout_p - cout)))
    return w.astype(dtype)


def _pack_wsc(w_oihw, cin, kpad, cout_p, dtype=jnp.bfloat16):
    # 1x1/stride-s shortcut conv input == center tap (kh=kw=1) of conv1 im2col.
    cout = w_oihw.shape[0]
    w = jnp.transpose(w_oihw[:, :, 0, 0], (1, 0))                   # (cin, cout)
    full = jnp.zeros((kpad, cout_p), w.dtype)
    full = full.at[4 * cin:5 * cin, :cout].set(w)
    return full.astype(dtype)


def _pad_vec(v, c_p):
    return jnp.pad(v, (0, c_p - v.shape[0]))


def _finalize_bn(ch_sum, ch_sq, gamma_p, beta_p, count):
    # fold batch-stat BN into one FMA per element: y*scale + bias
    mean = ch_sum / count
    var = jnp.maximum(ch_sq / count - mean * mean, 0.0)
    scale = gamma_p.reshape(1, -1) * jax.lax.rsqrt(var + EPS)
    bias = beta_p.reshape(1, -1) - mean * scale
    return scale, bias                                              # (1, c_p)


def init_params(key, in_planes, planes, stride):
    ks = jax.random.split(key, 9)
    f32 = jnp.float32
    p = {
        "w1": 0.1 * jax.random.normal(ks[0], (planes, in_planes, 3, 3), f32),
        "g1": 1.0 + 0.1 * jax.random.normal(ks[1], (planes,), f32),
        "b1": 0.1 * jax.random.normal(ks[2], (planes,), f32),
        "w2": 0.1 * jax.random.normal(ks[3], (planes, planes, 3, 3), f32),
        "g2": 1.0 + 0.1 * jax.random.normal(ks[4], (planes,), f32),
        "b2": 0.1 * jax.random.normal(ks[5], (planes,), f32),
        # _make_masks(): masks are all ones
        "m1": jnp.ones((planes, in_planes, 3, 3), f32),
        "m2": jnp.ones((planes, planes, 3, 3), f32),
    }
    if stride != 1 or in_planes != planes:
        p["wsc"] = 0.1 * jax.random.normal(ks[6], (planes, in_planes, 1, 1), f32)
        p["gsc"] = 1.0 + 0.05 * jax.random.normal(ks[7], (planes,), f32)
        p["bsc"] = 0.05 * jax.random.normal(ks[8], (planes,), f32)
        p["msc"] = jnp.ones((planes, in_planes, 1, 1), f32)
    else:
        p["msc"] = jnp.ones((planes,), f32)
    return p


# ---------------------------------------------------------------------------
# BasicBlock forward (Pallas)
# ---------------------------------------------------------------------------
def basic_block_forward(x_nchw, params, in_planes, planes, stride):
    assert stride in (1, 2)
    x = jnp.transpose(x_nchw, (0, 2, 3, 1)).astype(jnp.float32)     # NHWC
    N, H, W, _ = x.shape
    cout_p = _round_up(planes, LANE)
    k1 = _round_up(9 * in_planes, LANE)
    k2 = _round_up(9 * planes, LANE)
    downsample = (stride != 1) or (in_planes != planes)

    # --- pass A: conv1 (+ fused shortcut conv) matmul + bn1/bnsc stats -----
    x1, Ho, Wo = _im2col_3x3(x, stride, k1)                          # (M, k1) bf16
    M = N * Ho * Wo
    w1 = _pack_w3x3(params["w1"] * params["m1"], k1, cout_p)
    if downsample:
        wsc = _pack_wsc(params["wsc"] * params["msc"], in_planes, k1, cout_p)
        wa = jnp.concatenate([w1, wsc], axis=1)                      # (k1, 2*cout_p)
    else:
        wa = w1
    ya, sumA, sqA = _matmul_stats_call(x1, wa)                       # ya bf16

    scale1, bias1 = _finalize_bn(sumA[:, :cout_p], sqA[:, :cout_p],
                                 _pad_vec(params["g1"], cout_p),
                                 _pad_vec(params["b1"], cout_p), M)

    # --- pass B1: bn1-apply + relu (elementwise) ----------------------------
    a1 = _bn_relu_call(ya, scale1, bias1, cout_p)                    # (M, cout_p) bf16

    # --- pass B2: conv2 matmul + bn2 stats -----------------------------------
    x2, _, _ = _im2col_3x3(a1.reshape(N, Ho, Wo, cout_p)[..., :planes], 1, k2)
    w2 = _pack_w3x3(params["w2"] * params["m2"], k2, cout_p)
    y2, sum2, sq2 = _matmul_stats_call(x2, w2)
    scale2, bias2 = _finalize_bn(sum2, sq2,
                                 _pad_vec(params["g2"], cout_p),
                                 _pad_vec(params["b2"], cout_p), M)

    # --- pass C: bn2-apply + shortcut + add + relu ---------------------------
    if downsample:
        scalesc, biassc = _finalize_bn(sumA[:, cout_p:], sqA[:, cout_p:],
                                       _pad_vec(params["gsc"], cout_p),
                                       _pad_vec(params["bsc"], cout_p), M)
        out = _final_downsample_call(y2, scale2, bias2, ya, scalesc, biassc,
                                     cout_p)
    else:
        xc = jnp.pad(x, ((0, 0), (0, 0), (0, 0), (0, cout_p - in_planes)))
        xc = xc.reshape(M, cout_p)
        msk = _pad_vec(params["msc"], cout_p).reshape(1, cout_p)
        out = _final_identity_call(y2, scale2, bias2, xc, msk, cout_p)

    out = out.reshape(N, Ho, Wo, cout_p)[..., :planes]
    return jnp.transpose(out, (0, 3, 1, 2))                          # NCHW


# ---------------------------------------------------------------------------
# Pure-JAX reference (matches the PyTorch forward semantics)
# ---------------------------------------------------------------------------
def _bn_ref(y_nchw, gamma, beta):
    mean = jnp.mean(y_nchw, axis=(0, 2, 3), keepdims=True)
    var = jnp.mean((y_nchw - mean) ** 2, axis=(0, 2, 3), keepdims=True)
    return ((y_nchw - mean) * jax.lax.rsqrt(var + EPS)
            * gamma.reshape(1, -1, 1, 1) + beta.reshape(1, -1, 1, 1))


def basic_block_reference(x, p, in_planes, planes, stride):
    conv = lambda a, w, s, pad: jax.lax.conv_general_dilated(
        a, w, (s, s), ((pad, pad), (pad, pad)),
        dimension_numbers=("NCHW", "OIHW", "NCHW"))
    out = conv(x, p["w1"] * p["m1"], stride, 1)
    out = jnp.maximum(_bn_ref(out, p["g1"], p["b1"]), 0.0)
    out = conv(out, p["w2"] * p["m2"], 1, 1)
    out = _bn_ref(out, p["g2"], p["b2"])
    if stride != 1 or in_planes != planes:
        sc = conv(x, p["wsc"] * p["msc"], stride, 0)
        sc = _bn_ref(sc, p["gsc"], p["bsc"])
    else:
        sc = x * p["msc"].reshape(1, -1, 1, 1)
    return jnp.maximum(out + sc, 0.0)


if __name__ == "__main__":
    key = jax.random.PRNGKey(0)
    k_x1, k_x2, k_p1, k_p2 = jax.random.split(key, 4)

    # Case 1: downsample block (stride=2, in_planes != planes) -> option 'B'.
    in_planes, planes, stride = 4, 8, 2
    x1 = jax.random.normal(k_x1, (2, in_planes, 16, 16), jnp.float32)
    params1 = init_params(k_p1, in_planes, planes, stride)
    out1 = basic_block_forward(x1, params1, in_planes, planes, stride)
    jax.block_until_ready(out1)
    ref1 = basic_block_reference(x1, params1, in_planes, planes, stride)
    assert out1.shape == (2, planes, 8, 8), out1.shape
    # bf16 MXU operands / intermediates -> looser tolerance than pure-f32
    assert jnp.allclose(out1, ref1, rtol=5e-2, atol=5e-2), "downsample mismatch"

    # Case 2: identity-shortcut block (stride=1, in_planes == planes).
    in_planes2, planes2, stride2 = 8, 8, 1
    x2 = jax.random.normal(k_x2, (2, in_planes2, 16, 16), jnp.float32)
    params2 = init_params(k_p2, in_planes2, planes2, stride2)
    out2 = basic_block_forward(x2, params2, in_planes2, planes2, stride2)
    jax.block_until_ready(out2)
    ref2 = basic_block_reference(x2, params2, in_planes2, planes2, stride2)
    assert out2.shape == (2, planes2, 16, 16), out2.shape
    assert jnp.allclose(out2, ref2, rtol=5e-2, atol=5e-2), "identity mismatch"

    print("KERNEL_OK")
</pallas_src>

<mosaic_0001>
module attributes {stable_mosaic.version = 11 : i64} {
  func.func @_matmul_stats_kernel(%arg0: i32, %arg1: memref<128x128xbf16, #tpu.memory_space<vmem>>, %arg2: memref<128x256xbf16, #tpu.memory_space<vmem>>, %arg3: memref<128x256xbf16, #tpu.memory_space<vmem>>, %arg4: memref<1x1x256xf32, #tpu.memory_space<vmem>>, %arg5: memref<1x1x256xf32, #tpu.memory_space<vmem>>) attributes {dimension_semantics = [#tpu.dimension_semantics<parallel>], iteration_bounds = array<i64: 1>, scalar_prefetch = 0 : i64, scratch_operands = 0 : i64, tpu.core_type = #tpu.core_type<tc>, window_params = [{transform_indices = @transform_0, window_bounds = array<i64: 128, 128>}, {pipeline_mode = #tpu.pipeline_mode<synchronous>, transform_indices = @transform_1, window_bounds = array<i64: 128, 256>}, {transform_indices = @transform_2, window_bounds = array<i64: 128, 256>}, {transform_indices = @transform_3, window_bounds = array<i64: 1, 1, 256>}, {transform_indices = @transform_4, window_bounds = array<i64: 1, 1, 256>}]} {
    %c0 = arith.constant 0 : index
    %c0_0 = arith.constant 0 : index
    %0 = vector.load %arg1[%c0, %c0_0] : memref<128x128xbf16, #tpu.memory_space<vmem>>, vector<128x128xbf16>
    %c0_1 = arith.constant 0 : index
    %c0_2 = arith.constant 0 : index
    %1 = vector.load %arg2[%c0_1, %c0_2] : memref<128x256xbf16, #tpu.memory_space<vmem>>, vector<128x256xbf16>
    %cst = arith.constant dense<0.000000e+00> : vector<128x256xf32>
    %2 = tpu.matmul %0, %1, %cst {dimension_numbers = #tpu.dot_dimension_numbers<[1], [0], [0], [1], [0, 0, 1, 1], [], []>} : vector<128x128xbf16>, vector<128x256xbf16>, vector<128x256xf32> -> vector<128x256xf32>
    %3 = arith.truncf %2 : vector<128x256xf32> to vector<128x256xbf16>
    %c0_3 = arith.constant 0 : index
    %c0_4 = arith.constant 0 : index
    %4 = vector.load %arg3[%c0_3, %c0_4] : memref<128x256xbf16, #tpu.memory_space<vmem>>, vector<128x256xbf16>
    tpu.vector_store %arg3[%c0_3, %c0_4], %3 {strides = array<i32>} : memref<128x256xbf16, #tpu.memory_space<vmem>>, vector<128x256xbf16>,
    %cst_5 = arith.constant dense<0.000000e+00> : vector<256xf32>
    %5 = vector.multi_reduction <add>, %2, %cst_5 [0] : vector<128x256xf32> to vector<256xf32>
    %6 = vector.shape_cast %5 : vector<256xf32> to vector<1x256xf32>
    %7 = vector.shape_cast %6 : vector<1x256xf32> to vector<1x1x256xf32>
    %c0_6 = arith.constant 0 : index
    %c0_7 = arith.constant 0 : index
    %c0_8 = arith.constant 0 : index
    %8 = vector.load %arg4[%c0_6, %c0_7, %c0_8] : memref<1x1x256xf32, #tpu.memory_space<vmem>>, vector<1x1x256xf32>
    tpu.vector_store %arg4[%c0_6, %c0_7, %c0_8], %7 {strides = array<i32>} : memref<1x1x256xf32, #tpu.memory_space<vmem>>, vector<1x1x256xf32>,
    %9 = arith.mulf %2, %2 : vector<128x256xf32>
    %cst_9 = arith.constant dense<0.000000e+00> : vector<256xf32>
    %10 = vector.multi_reduction <add>, %9, %cst_9 [0] : vector<128x256xf32> to vector<256xf32>
    %11 = vector.shape_cast %10 : vector<256xf32> to vector<1x256xf32>
    %12 = vector.shape_cast %11 : vector<1x256xf32> to vector<1x1x256xf32>
    %c0_10 = arith.constant 0 : index
    %c0_11 = arith.constant 0 : index
    %c0_12 = arith.constant 0 : index
    %13 = vector.load %arg5[%c0_10, %c0_11, %c0_12] : memref<1x1x256xf32, #tpu.memory_space<vmem>>, vector<1x1x256xf32>
    tpu.vector_store %arg5[%c0_10, %c0_11, %c0_12], %12 {strides = array<i32>} : memref<1x1x256xf32, #tpu.memory_space<vmem>>, vector<1x1x256xf32>,
    return
  }
  func.func @transform_0(%arg0: i32) -> (i32, i32) {
    %c0_i32 = arith.constant 0 : i32
    %c0_i32_0 = arith.constant 0 : i32
    return %arg0, %c0_i32 : i32, i32
  }
  func.func @transform_1(%arg0: i32) -> (i32, i32) {
    %c0_i32 = arith.constant 0 : i32
    %c0_i32_0 = arith.constant 0 : i32
    %c0_i32_1 = arith.constant 0 : i32
    return %c0_i32, %c0_i32_0 : i32, i32
  }
  func.func @transform_2(%arg0: i32) -> (i32, i32) {
    %c0_i32 = arith.constant 0 : i32
    %c0_i32_0 = arith.constant 0 : i32
    return %arg0, %c0_i32 : i32, i32
  }
  func.func @transform_3(%arg0: i32) -> (i32, i32, i32) {
    %c0_i32 = arith.constant 0 : i32
    %c0_i32_0 = arith.constant 0 : i32
    %c0_i32_1 = arith.constant 0 : i32
    return %arg0, %c0_i32, %c0_i32_0 : i32, i32, i32
  }
  func.func @transform_4(%arg0: i32) -> (i32, i32, i32) {
    %c0_i32 = arith.constant 0 : i32
    %c0_i32_0 = arith.constant 0 : i32
    %c0_i32_1 = arith.constant 0 : i32
    return %arg0, %c0_i32, %c0_i32_0 : i32, i32, i32
  }
}

</mosaic_0001>

<bundles_post_ra>
// kernel: tpu_custom_call.1
= control target key start
LH: loop header
LB: loop body
LE: loop exit
PB: predicated region body
PF: predicated region fallthrough
CT: control target
= control target key end

     0   :  { %10 = vsyncpa [#allocation3], 0  ;;  %s1080_s0 = inlined_call_operand.hbm [shape: bf16[128,128], index: 0, kind: input, shape index: {}]   ;;  %s1081_s1 = inlined_call_operand.hbm [shape: bf16[128,256], index: 1, kind: input, shape index: {}]   ;;  %s1082_s2 = inlined_call_operand.hbm [shape: bf16[128,256], index: 2, kind: output, shape index: {0}]   ;;  %s1083_s3 = inlined_call_operand.hbm [shape: f32[1,1,256], index: 3, kind: output, shape index: {1}]   ;;  %s1084_s4 = inlined_call_operand.hbm [shape: f32[1,1,256], index: 4, kind: output, shape index: {2}]  }
   0x1   :  { %11 = vsyncpa [#allocation6], 0 }
   0x2   :  { %12 = vsyncpa [#allocation4], 0 }
   0x3   :  { %13 = vsyncpa [#allocation9], 0  ;;  %s866_s15 = smov [#allocation2]   ;;  %s748_s19 = scalar_lea.hbm %s1080_s0, 1024 }
   0x4   :  { %s19_s16 = sshll.u32 %s866_s15, 4  ;;  %p749_p0 = scmp.ne.s32.totalorder %s1080_s0, %s748_s19  ;;  %s20_s16 = int_to_ptr.vmem [resolvable:$true] %s19_s16 }
   0x5   :  { %p752_p1 = scmp.lt.u32.totalorder %s748_s19, %s1080_s0 }
   0x7   :  { %p754_p2 = pnand %p752_p1, %p749_p0 }
   0x9   :  { %757 = shalt.err (!%p754_p2)
}
   0xa   :  { %s758_s24 = scalar_lea.vmem %s20_s16, 1024  ;;  %p763_p4 = scmp.lt.s32.totalorder %s20_s16, %s20_s16 }
   0xb   :  { %p759_p3 = scmp.ne.s32.totalorder %s20_s16, %s758_s24  ;;  %p764_p5 = scmp.lt.s32.totalorder %s758_s24, %s758_s24 }
   0xd   :  { %p765_p6 = por %p764_p5, %p763_p4 }
   0xf   :  { %p766_p7 = pnand %p765_p6, %p759_p3 }
  0x11   :  { %769 = shalt.err (!%p766_p7)
}
  0x12   :  { %s867_s25 = smov 64   ;;  %s868_s26 = smov 4  }
  0x13   :  { %25 = dma.hbm_to_vmem [thread:$0]  %s1080_s0, 1024, %s20_s16, [#allocation3], %s867_s25, %s867_s25, %s868_s26  }
  0x14   :  { %s869_s29 = smov [#allocation5]   ;;  %s770_s7 = scalar_lea.hbm %s1081_s1, 2048 }
  0x15   :  { %s31_s30 = sshll.u32 %s869_s29, 4  ;;  %p771_p8 = scmp.ne.s32.totalorder %s1081_s1, %s770_s7  ;;  %s32_s30 = int_to_ptr.vmem [resolvable:$true] %s31_s30 }
  0x16   :  { %p774_p9 = scmp.lt.u32.totalorder %s770_s7, %s1081_s1 }
  0x18   :  { %p776_p10 = pnand %p774_p9, %p771_p8 }
  0x1a   :  { %779 = shalt.err (!%p776_p10)
}
  0x1b   :  { %s780_s12 = scalar_lea.vmem %s32_s30, 2048  ;;  %p785_p12 = scmp.lt.s32.totalorder %s32_s30, %s32_s30 }
  0x1c   :  { %p781_p11 = scmp.ne.s32.totalorder %s32_s30, %s780_s12  ;;  %p786_p13 = scmp.lt.s32.totalorder %s780_s12, %s780_s12 }
  0x1e   :  { %p787_p0 = por %p786_p13, %p785_p12 }
  0x20   :  { %p788_p1 = pnand %p787_p0, %p781_p11 }
  0x22   :  { %791 = shalt.err (!%p788_p1)
}
  0x23   :  { %s870_s0 = smov 128   ;;  %s871_s13 = smov 8  }
  0x24   :  { %37 = dma.hbm_to_vmem [thread:$0]  %s1081_s1, 2048, %s32_s30, [#allocation6], %s870_s0, %s870_s0, %s871_s13  }
  0x25   :  { %858 = dma.done.wait [#allocation3], 1024  }
  0x26   :  { %859 = vsyncadd [#allocation3], 4294966272 }
  0x27   :  { %860 = dma.done.wait [#allocation6], 2048  }
  0x28   :  { %861 = vsyncadd [#allocation6], 4294965248  ;;  %v872_v0 = vmov 0   ;;  %v716_v1 = vld [vmem:[#allocation5 + $0x4] ss:$8 sps:$4 sm:$0xff]   ;;  %v743_v21 = vld [vmem:[#allocation2 + $0x10] sm:$0xff]  }
  0x29   :  { %237 = vmatprep.mubr.bf16.mxu0 %v872_v0  ;;  %277 = vmatprep.mubr.bf16.mxu1 %v872_v0  ;;  %v718_v2 = vld [vmem:[#allocation5] ss:$8 sps:$4 sm:$0xff]   ;;  %v719_v3 = vld [vmem:[#allocation5 + $0x14] ss:$8 sps:$4 sm:$0xff]   ;;  %v721_v4 = vld [vmem:[#allocation5 + $0x10] ss:$8 sps:$4 sm:$0xff]  }
  0x2a   :  { %205 = vmatprep.subr.bf16.mxu0 %v716_v1  ;;  %689 = vmatprep.subr.bf16.mxu1 %v716_v1  ;;  %v722_v5 = vld [vmem:[#allocation5 + $0x24] ss:$8 sps:$4 sm:$0xff]   ;;  %v724_v6 = vld [vmem:[#allocation5 + $0x20] ss:$8 sps:$4 sm:$0xff]   ;;  %v725_v7 = vld [vmem:[#allocation5 + $0x34] ss:$8 sps:$4 sm:$0xff]  }
  0x2b   :  { %206 = vmatpush1.bf16.msra.mxu0 %v718_v2  ;;  %697 = vmatpush1.bf16.msra.mxu1 %v718_v2  ;;  %v727_v8 = vld [vmem:[#allocation5 + $0x30] ss:$8 sps:$4 sm:$0xff]   ;;  %v728_v9 = vld [vmem:[#allocation5 + $0x44] ss:$8 sps:$4 sm:$0xff]   ;;  %v730_v10 = vld [vmem:[#allocation5 + $0x40] ss:$8 sps:$4 sm:$0xff]  }
  0x2c   :  { %207 = vmatprep.subr.bf16.mxu0 %v719_v3  ;;  %690 = vmatprep.subr.bf16.mxu1 %v719_v3  ;;  %v731_v11 = vld [vmem:[#allocation5 + $0x54] ss:$8 sps:$4 sm:$0xff]   ;;  %v733_v12 = vld [vmem:[#allocation5 + $0x50] ss:$8 sps:$4 sm:$0xff]   ;;  %v734_v13 = vld [vmem:[#allocation5 + $0x64] ss:$8 sps:$4 sm:$0xff]  }
  0x2d   :  { %v736_v14 = vld [vmem:[#allocation5 + $0x60] ss:$8 sps:$4 sm:$0xff]   ;;  %v737_v15 = vld [vmem:[#allocation5 + $0x74] ss:$8 sps:$4 sm:$0xff]   ;;  %v739_v16 = vld [vmem:[#allocation5 + $0x70] ss:$8 sps:$4 sm:$0xff]  }
  0x2e   :  { %v740_v17 = vld [vmem:[#allocation2] sm:$0xff]   ;;  %v741_v19 = vld [vmem:[#allocation2 + $0x8] sm:$0xff]   ;;  %v746_v22 = vld [vmem:[#allocation2 + $0x30] sm:$0xff]   ;;  %s873_s1 = smov [#allocation7]  }
  0x2f   :  { %208 = vmatpush1.bf16.msra.mxu0 %v721_v4  ;;  %698 = vmatpush1.bf16.msra.mxu1 %v721_v4  ;;  %v742_v18 = vld [vmem:[#allocation2 + $0x20] sm:$0xff]   ;;  %v744_v20 = vld [vmem:[#allocation2 + $0x28] sm:$0xff]   ;;  %v745_v23 = vld [vmem:[#allocation2 + $0x18] sm:$0xff]   ;;  %s593_s16 = sshll.u32 %s873_s1, 4  ;;  %s594_s16 = int_to_ptr.vmem [resolvable:$true] %s593_s16 }
  0x30   :  { %209 = vmatprep.subr.bf16.mxu0 %v722_v5  ;;  %691 = vmatprep.subr.bf16.mxu1 %v722_v5  ;;  %v747_v24 = vld [vmem:[#allocation2 + $0x38] sm:$0xff]   ;;  %s792_s17 = scalar_lea.vmem %s594_s16, 2048  ;;  %p797_p3 = scmp.lt.s32.totalorder %s594_s16, %s594_s16 }
  0x31   :  { %p793_p2 = scmp.ne.s32.totalorder %s594_s16, %s792_s17  ;;  %p798_p4 = scmp.lt.s32.totalorder %s792_s17, %s792_s17 }
  0x33   :  { %210 = vmatpush1.bf16.msra.mxu0 %v724_v6  ;;  %699 = vmatpush1.bf16.msra.mxu1 %v724_v6  ;;  %p799_p5 = por %p798_p4, %p797_p3 }
  0x34   :  { %211 = vmatprep.subr.bf16.mxu0 %v725_v7  ;;  %692 = vmatprep.subr.bf16.mxu1 %v725_v7 }
  0x35   :  { %p800_p6 = pnand %p799_p5, %p793_p2 }
  0x37   :  { %212 = vmatpush1.bf16.msra.mxu0 %v727_v8  ;;  %700 = vmatpush1.bf16.msra.mxu1 %v727_v8 }
  0x38   :  { %213 = vmatprep.subr.bf16.mxu0 %v728_v9  ;;  %693 = vmatprep.subr.bf16.mxu1 %v728_v9 }
  0x3b   :  { %214 = vmatpush1.bf16.msra.mxu0 %v730_v10  ;;  %701 = vmatpush1.bf16.msra.mxu1 %v730_v10 }
  0x3c   :  { %215 = vmatprep.subr.bf16.mxu0 %v731_v11  ;;  %694 = vmatprep.subr.bf16.mxu1 %v731_v11 }
  0x3f   :  { %216 = vmatpush1.bf16.msra.mxu0 %v733_v12  ;;  %702 = vmatpush1.bf16.msra.mxu1 %v733_v12 }
  0x40   :  { %217 = vmatprep.subr.bf16.mxu0 %v734_v13  ;;  %695 = vmatprep.subr.bf16.mxu1 %v734_v13 }
  0x43   :  { %218 = vmatpush1.bf16.msra.mxu0 %v736_v14  ;;  %703 = vmatpush1.bf16.msra.mxu1 %v736_v14 }
  0x44   :  { %219 = vmatprep.subr.bf16.mxu0 %v737_v15  ;;  %696 = vmatprep.subr.bf16.mxu1 %v737_v15 }
  0x47   :  { %220 = vmatpush1.bf16.msra.mxu0 %v739_v16  ;;  %704 = vmatpush1.bf16.msra.mxu1 %v739_v16 }
  0x4a   :  { %238 = vmatmul.mubr.bf16.vlgmr.msra.gmra.mrb[0].mxu0 %v740_v17  ;;  %278 = vmatmul.mubr.bf16.vlgmr.msra.gmra.mrb[0].mxu1 %v742_v18 }
  0x4b   :  { %247 = vmatprep.mubr.bf16.mxu0 %v872_v0  ;;  %287 = vmatprep.mubr.bf16.mxu1 %v872_v0 }
  0x52   :  { %248 = vmatmul.mubr.bf16.gmra.mrb[4].mxu0 %v741_v19  ;;  %288 = vmatmul.mubr.bf16.gmra.mrb[4].mxu1 %v744_v20 }
  0x53   :  { %257 = vmatprep.mubr.bf16.mxu0 %v872_v0  ;;  %297 = vmatprep.mubr.bf16.mxu1 %v872_v0 }
  0x5a   :  { %258 = vmatmul.mubr.bf16.gmra.mrb[8].mxu0 %v743_v21  ;;  %298 = vmatmul.mubr.bf16.gmra.mrb[8].mxu1 %v746_v22 }
  0x5b   :  { %267 = vmatprep.mubr.bf16.mxu0 %v872_v0  ;;  %307 = vmatprep.mubr.bf16.mxu1 %v872_v0 }
  0x62   :  { %268 = vmatmul.mubr.bf16.gmra.mrb[12].mxu0 %v745_v23  ;;  %308 = vmatmul.mubr.bf16.gmra.mrb[12].mxu1 %v747_v24 }
 0x11d   :  { %v239_v25 = vpop.f32.mrb[0].mxu0  ;;  %v937_v26 = vpop.f32.mrb[0].mxu1 }
 0x11e   :  { %v241_v27 = vpop.f32.mrb[1].mxu0  ;;  %v939_v28 = vpop.f32.mrb[1].mxu1  ;;  %v495_v33 = vmul.f32 %v239_v25, %v239_v25 }
 0x11f   :  { %v673_v29 = vpack.c.bf16 %v241_v27, %v239_v25  ;;  %v243_v30 = vpop.f32.mrb[2].mxu0  ;;  %v681_v31 = vpack.c.bf16 %v939_v28, %v937_v26  ;;  %v943_v32 = vpop.f32.mrb[2].mxu1  ;;  %v496_v34 = vmul.f32 %v241_v27, %v241_v27 }
 0x120   :  { %v430_v35 = vadd.f32 %v243_v30, %v239_v25  ;;  %v497_v36 = vmul.f32 %v243_v30, %v243_v30  ;;  %v245_v37 = vpop.f32.mrb[3].mxu0  ;;  %v945_v38 = vpop.f32.mrb[3].mxu1 }
 0x121   :  { %414 = vst [vmem:[#allocation7] sm:$0xff] %v673_v29  ;;  %v674_v39 = vpack.c.bf16 %v245_v37, %v243_v30  ;;  %v451_v40 = vadd.f32 %v245_v37, %v241_v27  ;;  %v498_v41 = vmul.f32 %v245_v37, %v245_v37  ;;  %422 = vst [vmem:[#allocation7 + $0x40] sm:$0xff] %v681_v31 }
 0x122   :  { %v682_v42 = vpack.c.bf16 %v945_v38, %v943_v32  ;;  %v527_v43 = vadd.f32 %v497_v36, %v495_v33 }
 0x123   :  { %415 = vst [vmem:[#allocation7 + $0x8] sm:$0xff] %v674_v39  ;;  %v548_v44 = vadd.f32 %v498_v41, %v496_v34 }
 0x124   :  { %423 = vst [vmem:[#allocation7 + $0x48] sm:$0xff] %v682_v42 }
 0x125   :  { %v249_v45 = vpop.f32.mrb[4].mxu0  ;;  %v949_v46 = vpop.f32.mrb[4].mxu1 }
 0x126   :  { %v431_v47 = vadd.f32 %v430_v35, %v249_v45  ;;  %v499_v48 = vmul.f32 %v249_v45, %v249_v45  ;;  %v251_v49 = vpop.f32.mrb[5].mxu0  ;;  %v951_v50 = vpop.f32.mrb[5].mxu1 }
 0x127   :  { %v675_v51 = vpack.c.bf16 %v251_v49, %v249_v45  ;;  %v452_v52 = vadd.f32 %v451_v40, %v251_v49  ;;  %v500_v53 = vmul.f32 %v251_v49, %v251_v49  ;;  %v253_v54 = vpop.f32.mrb[6].mxu0  ;;  %v683_v55 = vpack.c.bf16 %v951_v50, %v949_v46  ;;  %v955_v56 = vpop.f32.mrb[6].mxu1 }
 0x128   :  { %v528_v57 = vadd.f32 %v527_v43, %v499_v48  ;;  %v432_v58 = vadd.f32 %v431_v47, %v253_v54  ;;  %v501_v59 = vmul.f32 %v253_v54, %v253_v54  ;;  %v255_v60 = vpop.f32.mrb[7].mxu0  ;;  %v957_v61 = vpop.f32.mrb[7].mxu1 }
 0x129   :  { %416 = vst [vmem:[#allocation7 + $0x10] sm:$0xff] %v675_v51  ;;  %v549_v62 = vadd.f32 %v548_v44, %v500_v53  ;;  %v676_v63 = vpack.c.bf16 %v255_v60, %v253_v54  ;;  %v453_v0 = vadd.f32 %v452_v52, %v255_v60  ;;  %v502_v1 = vmul.f32 %v255_v60, %v255_v60 }
 0x12a   :  { %424 = vst [vmem:[#allocation7 + $0x50] sm:$0xff] %v683_v55  ;;  %v529_v2 = vadd.f32 %v528_v57, %v501_v59  ;;  %v684_v3 = vpack.c.bf16 %v957_v61, %v955_v56  ;;  %v511_v57 = vmul.f32 %v937_v26, %v937_v26 }
 0x12b   :  { %417 = vst [vmem:[#allocation7 + $0x18] sm:$0xff] %v676_v63  ;;  %v550_v4 = vadd.f32 %v549_v62, %v502_v1  ;;  %v512_v62 = vmul.f32 %v939_v28, %v939_v28  ;;  %v513_v1 = vmul.f32 %v943_v32, %v943_v32 }
 0x12c   :  { %425 = vst [vmem:[#allocation7 + $0x58] sm:$0xff] %v684_v3 }
 0x12d   :  { %v259_v5 = vpop.f32.mrb[8].mxu0  ;;  %v961_v6 = vpop.f32.mrb[8].mxu1 }
 0x12e   :  { %v433_v7 = vadd.f32 %v432_v58, %v259_v5  ;;  %v503_v8 = vmul.f32 %v259_v5, %v259_v5  ;;  %v261_v9 = vpop.f32.mrb[9].mxu0  ;;  %v963_v10 = vpop.f32.mrb[9].mxu1 }
 0x12f   :  { %v677_v11 = vpack.c.bf16 %v261_v9, %v259_v5  ;;  %v454_v12 = vadd.f32 %v453_v0, %v261_v9  ;;  %v504_v13 = vmul.f32 %v261_v9, %v261_v9  ;;  %v263_v14 = vpop.f32.mrb[10].mxu0  ;;  %v685_v15 = vpack.c.bf16 %v963_v10, %v961_v6  ;;  %v967_v16 = vpop.f32.mrb[10].mxu1 }
 0x130   :  { %v530_v17 = vadd.f32 %v529_v2, %v503_v8  ;;  %v434_v18 = vadd.f32 %v433_v7, %v263_v14  ;;  %v505_v19 = vmul.f32 %v263_v14, %v263_v14  ;;  %v265_v20 = vpop.f32.mrb[11].mxu0  ;;  %v969_v21 = vpop.f32.mrb[11].mxu1 }
 0x131   :  { %418 = vst [vmem:[#allocation7 + $0x20] sm:$0xff] %v677_v11  ;;  %v551_v22 = vadd.f32 %v550_v4, %v504_v13  ;;  %v678_v23 = vpack.c.bf16 %v265_v20, %v263_v14  ;;  %v455_v24 = vadd.f32 %v454_v12, %v265_v20  ;;  %v506_v25 = vmul.f32 %v265_v20, %v265_v20 }
 0x132   :  { %426 = vst [vmem:[#allocation7 + $0x60] sm:$0xff] %v685_v15  ;;  %v531_v27 = vadd.f32 %v530_v17, %v505_v19  ;;  %v686_v29 = vpack.c.bf16 %v969_v21, %v967_v16 }
 0x133   :  { %419 = vst [vmem:[#allocation7 + $0x28] sm:$0xff] %v678_v23  ;;  %v552_v30 = vadd.f32 %v551_v22, %v506_v25 }
 0x134   :  { %427 = vst [vmem:[#allocation7 + $0x68] sm:$0xff] %v686_v29 }
 0x135   :  { %v269_v31 = vpop.f32.mrb[12].mxu0  ;;  %v973_v33 = vpop.f32.mrb[12].mxu1 }
 0x136   :  { %v435_v34 = vadd.f32 %v434_v18, %v269_v31  ;;  %v507_v35 = vmul.f32 %v269_v31, %v269_v31  ;;  %v271_v36 = vpop.f32.mrb[13].mxu0  ;;  %v975_v37 = vpop.f32.mrb[13].mxu1 }
 0x137   :  { %v679_v39 = vpack.c.bf16 %v271_v36, %v269_v31  ;;  %v456_v40 = vadd.f32 %v455_v24, %v271_v36  ;;  %v508_v41 = vmul.f32 %v271_v36, %v271_v36  ;;  %v273_v42 = vpop.f32.mrb[14].mxu0  ;;  %v687_v43 = vpack.c.bf16 %v975_v37, %v973_v33  ;;  %v979_v44 = vpop.f32.mrb[14].mxu1 }
 0x138   :  { %v532_v45 = vadd.f32 %v531_v27, %v507_v35  ;;  %v436_v47 = vadd.f32 %v435_v34, %v273_v42  ;;  %v509_v48 = vmul.f32 %v273_v42, %v273_v42  ;;  %v275_v49 = vpop.f32.mrb[15].mxu0  ;;  %v981_v51 = vpop.f32.mrb[15].mxu1 }
 0x139   :  { %420 = vst [vmem:[#allocation7 + $0x30] sm:$0xff] %v679_v39  ;;  %v553_v52 = vadd.f32 %v552_v30, %v508_v41  ;;  %v680_v53 = vpack.c.bf16 %v275_v49, %v273_v42  ;;  %v457_v54 = vadd.f32 %v456_v40, %v275_v49  ;;  %v510_v55 = vmul.f32 %v275_v49, %v275_v49 }
 0x13a   :  { %428 = vst [vmem:[#allocation7 + $0x70] sm:$0xff] %v687_v43  ;;  %v437_v58 = vadd.f32 %v436_v47, %v937_v26  ;;  %v533_v59 = vadd.f32 %v532_v45, %v509_v48  ;;  %v688_v60 = vpack.c.bf16 %v981_v51, %v979_v44  ;;  %v514_v26 = vmul.f32 %v945_v38, %v945_v38 }
 0x13b   :  { %421 = vst [vmem:[#allocation7 + $0x38] sm:$0xff] %v680_v53  ;;  %v458_v63 = vadd.f32 %v457_v54, %v939_v28  ;;  %v554_v0 = vadd.f32 %v553_v52, %v510_v55 }
 0x13c   :  { %v438_v2 = vadd.f32 %v437_v58, %v943_v32  ;;  %v534_v3 = vadd.f32 %v533_v59, %v511_v57  ;;  %429 = vst [vmem:[#allocation7 + $0x78] sm:$0xff] %v688_v60 }
 0x13d   :  { %v459_v4 = vadd.f32 %v458_v63, %v945_v38  ;;  %v555_v5 = vadd.f32 %v554_v0, %v512_v62 }
 0x13e   :  { %803 = shalt.err (!%p800_p6)
}
 0x13f   :  { %s804_s20 = scalar_lea.hbm %s1082_s2, 2048 }
 0x140   :  { %p805_p7 = scmp.ne.s32.totalorder %s1082_s2, %s804_s20  ;;  %p808_p8 = scmp.lt.u32.totalorder %s804_s20, %s1082_s2 }
 0x142   :  { %p810_p9 = pnand %p808_p8, %p805_p7 }
 0x144   :  { %813 = shalt.err (!%p810_p9)
}
 0x145   :  { %599 = dma.vmem_to_hbm [thread:$0]  %s594_s16, 2048, %s1082_s2, [#allocation4], %s870_s0, %s870_s0, %s871_s13   ;;  %v515_v28 = vmul.f32 %v949_v46, %v949_v46  ;;  %v535_v32 = vadd.f32 %v534_v3, %v513_v1  ;;  %v439_v38 = vadd.f32 %v438_v2, %v949_v46  ;;  %v516_v7 = vmul.f32 %v951_v50, %v951_v50 }
 0x146   :  { %v556_v8 = vadd.f32 %v555_v5, %v514_v26  ;;  %v460_v9 = vadd.f32 %v459_v4, %v951_v50  ;;  %v517_v11 = vmul.f32 %v955_v56, %v955_v56  ;;  %v518_v14 = vmul.f32 %v957_v61, %v957_v61  ;;  %s875_s2 = smov [#allocation8]   ;;  %s876_s28 = smov [#allocation10]  }
 0x147   :  { %v440_v12 = vadd.f32 %v439_v38, %v955_v56  ;;  %v536_v13 = vadd.f32 %v535_v32, %v515_v28  ;;  %v519_v18 = vmul.f32 %v961_v6, %v961_v6  ;;  %v520_v20 = vmul.f32 %v963_v10, %v963_v10  ;;  %s606_s27 = sshll.u32 %s875_s2, 4  ;;  %s616_s29 = sshll.u32 %s876_s28, 4  ;;  %s607_s27 = int_to_ptr.vmem [resolvable:$true] %s606_s27  ;;  %s617_s29 = int_to_ptr.vmem [resolvable:$true] %s616_s29 }
 0x148   :  { %v461_v15 = vadd.f32 %v460_v9, %v957_v61  ;;  %v557_v17 = vadd.f32 %v556_v8, %v516_v7  ;;  %v521_v24 = vmul.f32 %v967_v16, %v967_v16  ;;  %v523_v61 = vmul.f32 %v973_v33, %v973_v33  ;;  %s814_s30 = scalar_lea.vmem %s607_s27, 32  ;;  %p819_p11 = scmp.lt.s32.totalorder %s607_s27, %s607_s27 }
 0x149   :  { %v441_v46 = vadd.f32 %v440_v12, %v961_v6  ;;  %v537_v19 = vadd.f32 %v536_v13, %v517_v11  ;;  %v522_v6 = vmul.f32 %v969_v21, %v969_v21  ;;  %v524_v29 = vmul.f32 %v975_v37, %v975_v37  ;;  %p815_p10 = scmp.ne.s32.totalorder %s607_s27, %s814_s30  ;;  %p820_p12 = scmp.lt.s32.totalorder %s814_s30, %s814_s30 }
 0x14a   :  { %v462_v50 = vadd.f32 %v461_v15, %v963_v10  ;;  %v558_v22 = vadd.f32 %v557_v17, %v518_v14  ;;  %v525_v36 = vmul.f32 %v979_v44, %v979_v44  ;;  %v874_v49 = vmov 1966171168  }
 0x14b   :  { %v538_v56 = vadd.f32 %v537_v19, %v519_v18  ;;  %v442_v23 = vadd.f32 %v441_v46, %v967_v16  ;;  %v476_v52 = vunpack.c.l.s4 %v874_v49  ;;  %v478_v53 = vlaneseq  ;;  %p821_p13 = por %p820_p12, %p819_p11 }
 0x14c   :  { %v559_v25 = vadd.f32 %v558_v22, %v520_v20  ;;  %v463_v27 = vadd.f32 %v462_v50, %v969_v21  ;;  %v526_v21 = vmul.f32 %v981_v51, %v981_v51 }
 0x14d   :  { %v539_v10 = vadd.f32 %v538_v56, %v521_v24  ;;  %v443_v30 = vadd.f32 %v442_v23, %v973_v33  ;;  %v479_v63 = vshrl.u32 %v478_v53, 7  ;;  %vm1048_vm0 = vcmp.lt.s32.totalorder %v478_v53, 256  ;;  %p822_p0 = pnand %p821_p13, %p815_p10 }
 0x14e   :  { %v560_v31 = vadd.f32 %v559_v25, %v522_v6  ;;  %v464_v34 = vadd.f32 %v463_v27, %v975_v37 }
 0x14f   :  { %v540_v35 = vadd.f32 %v539_v10, %v523_v61  ;;  %v444_v16 = vadd.f32 %v443_v30, %v979_v44 }
 0x150   :  { %v561_v39 = vadd.f32 %v560_v31, %v524_v29  ;;  %v465_v40 = vadd.f32 %v464_v34, %v981_v51  ;;  %v477_v51 = vunpack.c.0.s8 %v476_v52 }
 0x151   :  { %v445_v41 = vrot.slane %v444_v16, 4  ;;  %v541_v42 = vadd.f32 %v540_v35, %v525_v36 }
 0x152   :  { %v466_v43 = vrot.slane %v465_v40, 4  ;;  %v562_v45 = vadd.f32 %v561_v39, %v526_v21  ;;  %v480_v32 = vsub.s32 %v477_v51, %v479_v63 }
 0x153   :  { %v446_v33 = vadd.f32 %v445_v41, %v444_v16  ;;  %v542_v47 = vrot.slane %v541_v42, 4 }
 0x154   :  { %v467_v48 = vadd.f32 %v466_v43, %v465_v40  ;;  %v563_v37 = vrot.slane %v562_v45, 4 }
 0x155   :  { %v447_v54 = vrot.slane %v446_v33, 2  ;;  %v543_v55 = vadd.f32 %v542_v47, %v541_v42 }
 0x156   :  { %v468_v44 = vrot.slane %v467_v48, 2  ;;  %v564_v57 = vadd.f32 %v563_v37, %v562_v45 }
 0x157   :  { %v448_v58 = vadd.f32 %v447_v54, %v446_v33  ;;  %v544_v59 = vrot.slane %v543_v55, 2 }
 0x158   :  { %v469_v60 = vadd.f32 %v468_v44, %v467_v48  ;;  %v565_v62 = vrot.slane %v564_v57, 2 }
 0x159   :  { %v449_v0 = vrot.slane %v448_v58, 1  ;;  %v545_v1 = vadd.f32 %v544_v59, %v543_v55 }
 0x15a   :  { %v470_v2 = vrot.slane %v469_v60, 1  ;;  %v566_v3 = vadd.f32 %v565_v62, %v564_v57 }
 0x15b   :  { %v450_v26 = vadd.f32 %v449_v0, %v448_v58  ;;  %v546_v4 = vrot.slane %v545_v1, 1 }
 0x15c   :  { %v471_v5 = vadd.f32 %v470_v2, %v469_v60  ;;  %v567_v28 = vrot.slane %v566_v3, 1 }
 0x15d   :  { %v547_v38 = vadd.f32 %v546_v4, %v545_v1 }
 0x15e   :  { %v474_v7 = vcombine.low %v450_v26, %v471_v5  ;;  %v568_v8 = vadd.f32 %v567_v28, %v566_v3 }
 0x160   :  { %v571_v9 = vcombine.low %v547_v38, %v568_v8  ;;  %v481_v11 = vrot.slane %v474_v7, %v480_v32 }
 0x162   :  { %v488_v13 = vrot.slane %v481_v11, %v480_v32  ;;  %v578_v14 = vrot.slane %v571_v9, %v480_v32 }
 0x164   :  { %494 = vst.msk [vmem:[#allocation8] sm:$0x3] %vm1048_vm0, %v488_v13  ;;  %v585_v15 = vrot.slane %v578_v14, %v480_v32 }
 0x165   :  { %825 = shalt.err (!%p822_p0)
}
 0x166   :  { %s826_s7 = scalar_lea.hbm %s1083_s3, 32 }
 0x167   :  { %p827_p1 = scmp.ne.s32.totalorder %s1083_s3, %s826_s7  ;;  %p830_p2 = scmp.lt.u32.totalorder %s826_s7, %s1083_s3 }
 0x169   :  { %p832_p3 = pnand %p830_p2, %p827_p1 }
 0x16b   :  { %835 = shalt.err (!%p832_p3)
}
 0x16c   :  { %609 = dma.vmem_to_hbm [thread:$0]  %s607_s27, 32, %s1083_s3, [#allocation9]   ;;  %587 = vst.msk [vmem:[#allocation10] sm:$0x3] %vm1048_vm0, %v585_v15 }
 0x16d   :  { %s836_s13 = scalar_lea.vmem %s617_s29, 32  ;;  %p841_p5 = scmp.lt.s32.totalorder %s617_s29, %s617_s29 }
 0x16e   :  { %p837_p4 = scmp.ne.s32.totalorder %s617_s29, %s836_s13  ;;  %p842_p6 = scmp.lt.s32.totalorder %s836_s13, %s836_s13 }
 0x170   :  { %p843_p7 = por %p842_p6, %p841_p5 }
 0x172   :  { %p844_p8 = pnand %p843_p7, %p837_p4 }
 0x174   :  { %847 = shalt.err (!%p844_p8)
}
 0x175   :  { %s848_s1 = scalar_lea.hbm %s1084_s4, 32 }
 0x176   :  { %p849_p9 = scmp.ne.s32.totalorder %s1084_s4, %s848_s1  ;;  %p852_p10 = scmp.lt.u32.totalorder %s848_s1, %s1084_s4 }
 0x178   :  { %p854_p11 = pnand %p852_p10, %p849_p9 }
 0x17a   :  { %857 = shalt.err (!%p854_p11)
}
 0x17b   :  { %619 = dma.vmem_to_hbm [thread:$0]  %s617_s29, 32, %s1084_s4, [#allocation9]  }
 0x17c   :  { %862 = dma.done.wait [#allocation4], 2048  }
 0x17d   :  { %863 = vsyncadd [#allocation4], 4294965248 }
 0x17e   :  { %864 = dma.done.wait [#allocation9], 64  }
 0x17f   :  { %865 = vsyncadd [#allocation9], 4294967232 }
 0x180   :  { %629 = vsyncpa [#allocation3], 1 }
 0x181   :  { %630 = vsyncpa [#allocation6], 1 }
 0x182   :  { %631 = vsyncpa [#allocation4], 1 }
 0x183   :  { %632 = vsyncpa [#allocation9], 1 }

</bundles_post_ra>
